<compile_context>
chip_gen: v5e
topology: v5e:2x2
jax: 0.10.0
libtpu: 0.0.40
codegen_flags: <defaults>
</compile_context>

<pallas_src>
import functools

import jax
import jax.numpy as jnp
from jax.experimental import pallas as pl
from jax.experimental.pallas import tpu as pltpu


def _conv2d_kernel(x_ref, w_ref, b_ref, o_ref, *, KH):
    # x_ref: (KH, N*OH, Wp*Cin)    kh-shifted, lane-packed activations
    # w_ref: (KH, Wp*Cin, OW*Cout) per-kh Toeplitz-expanded weights
    # b_ref: (1, OW*Cout)          bias tiled over the packed (ow, co) lanes
    # o_ref: (N*OH, OW*Cout)       lane-dense output
    acc = b_ref[...] + jnp.dot(x_ref[0], w_ref[0],
                               preferred_element_type=jnp.float32)
    for kh in range(1, KH):  # static unroll over kernel rows
        acc = acc + jnp.dot(x_ref[kh], w_ref[kh],
                            preferred_element_type=jnp.float32)
    o_ref[...] = acc.astype(o_ref.dtype)


def meta_conv2d(x_nchw, weight_oihw, bias, *, stride=1, padding=1, dilation=1,
                groups=1):
    """Forward of MetaConv2d: conv2d(x, weight, bias, 1, padding, 1, 1)."""
    assert stride == 1 and dilation == 1 and groups == 1, (
        "Pallas meta_conv2d only implements stride=1, dilation=1, groups=1")

    N, Cin, H, W = x_nchw.shape
    Cout, Cin_w, KH, KW = weight_oihw.shape
    assert Cin == Cin_w
    OH = H + 2 * padding - KH + 1
    OW = W + 2 * padding - KW + 1
    Hp, Wp = H + 2 * padding, W + 2 * padding

    if bias is None:
        bias = jnp.zeros((Cout,), x_nchw.dtype)

    # ---- wrapper-side layout plumbing (cheap one-time glue) -----------------
    # NCHW -> NHWC, zero-pad spatially, pack (W, Cin) onto the lane axis.
    x_nhwc = jnp.transpose(x_nchw, (0, 2, 3, 1))
    x_pad = jnp.pad(x_nhwc,
                    ((0, 0), (padding, padding), (padding, padding), (0, 0)))
    x_packed = x_pad.reshape(N, Hp, Wp * Cin)
    # kh-shifted stack ("im2col over H"):
    #   x_sh[kh, n*OH + oh, wp*Cin + ci] = x_pad[n, oh + kh, wp, ci]
    x_sh = jnp.stack(
        [x_packed[:, kh:kh + OH, :].reshape(N * OH, Wp * Cin)
         for kh in range(KH)],
        axis=0)

    # Toeplitz expansion of the weights over the W axis:
    #   w_big[kh, wp*Cin+ci, ow*Cout+co] = weight[co, ci, kh, wp-ow]
    #                                      if 0 <= wp-ow < KW else 0
    w_t = jnp.transpose(weight_oihw, (2, 3, 1, 0))                # (KH, KW, Cin, Cout)
    kw_rel = jnp.arange(Wp)[:, None] - jnp.arange(OW)[None, :]    # (Wp, OW)
    valid = (kw_rel >= 0) & (kw_rel < KW)
    w_gath = w_t[:, jnp.clip(kw_rel, 0, KW - 1), :, :]            # (KH, Wp, OW, Cin, Cout)
    w_gath = jnp.where(valid[None, :, :, None, None], w_gath, 0.0)
    w_big = jnp.transpose(w_gath, (0, 1, 3, 2, 4)).reshape(KH, Wp * Cin, OW * Cout)

    # Bias tiled across the packed (ow, co) lane axis.
    b_row = jnp.tile(bias, OW).reshape(1, OW * Cout)

    NOH, OWC, WC = N * OH, OW * Cout, Wp * Cin
    kernel = functools.partial(_conv2d_kernel, KH=KH)

    out_flat = pl.pallas_call(
        kernel,
        out_shape=jax.ShapeDtypeStruct((NOH, OWC), x_nchw.dtype),
        grid_spec=pltpu.PrefetchScalarGridSpec(
            num_scalar_prefetch=0,
            grid=(1,),  # whole problem in one step; re-tile only if scaled up
            in_specs=[
                pl.BlockSpec((KH, NOH, WC), lambda i: (0, 0, 0)),
                pl.BlockSpec((KH, WC, OWC), lambda i: (0, 0, 0)),
                pl.BlockSpec((1, OWC), lambda i: (0, 0)),
            ],
            out_specs=pl.BlockSpec((NOH, OWC), lambda i: (0, 0)),
        ),
        compiler_params=pltpu.CompilerParams(
            dimension_semantics=("arbitrary",)),
    )(x_sh, w_big, b_row)

    # (N*OH, OW*Cout) -> (N, OH, OW, Cout) -> NCHW (PyTorch convention).
    out = out_flat.reshape(N, OH, OW, Cout)
    return jnp.transpose(out, (0, 3, 1, 2))


if __name__ == "__main__":
    # Synthetic MetaConv2d(4, 8, kernel_size=3, stride=1, padding=1, bias=True)
    N, Cin, H, W = 2, 4, 16, 16
    Cout, KH, KW = 8, 3, 3

    key = jax.random.PRNGKey(0)
    kx, kw, kb = jax.random.split(key, 3)
    x = jax.random.normal(kx, (N, Cin, H, W), dtype=jnp.float32)
    # Deterministic param init (mimics Conv2d's uniform scale, no checkpoint).
    fan_in = Cin * KH * KW
    bound = 1.0 / (fan_in ** 0.5)
    weight = jax.random.uniform(kw, (Cout, Cin, KH, KW), jnp.float32, -bound, bound)
    bias = jax.random.uniform(kb, (Cout,), jnp.float32, -bound, bound)

    out = meta_conv2d(x, weight, bias, padding=1)
    out = jax.block_until_ready(out)

    # Reference check against XLA's conv.
    ref = jax.lax.conv_general_dilated(
        x, weight, window_strides=(1, 1), padding=((1, 1), (1, 1)),
        dimension_numbers=("NCHW", "OIHW", "NCHW"))
    ref = ref + bias[None, :, None, None]
    assert out.shape == (N, Cout, H, W)
    assert jnp.allclose(out, ref, atol=1e-4, rtol=1e-4)

    print("KERNEL_OK")
</pallas_src>

<mosaic_0001>
module attributes {stable_mosaic.version = 11 : i64} {
  func.func @_conv2d_kernel(%arg0: i32, %arg1: memref<3x32x72xf32, #tpu.memory_space<vmem>>, %arg2: memref<3x72x128xf32, #tpu.memory_space<vmem>>, %arg3: memref<1x128xf32, #tpu.memory_space<vmem>>, %arg4: memref<32x128xf32, #tpu.memory_space<vmem>>) attributes {dimension_semantics = [#tpu.dimension_semantics<arbitrary>], iteration_bounds = array<i64: 1>, scalar_prefetch = 0 : i64, scratch_operands = 0 : i64, tpu.core_type = #tpu.core_type<tc>, window_params = [{pipeline_mode = #tpu.pipeline_mode<synchronous>, transform_indices = @transform_0, window_bounds = array<i64: 3, 32, 72>}, {pipeline_mode = #tpu.pipeline_mode<synchronous>, transform_indices = @transform_1, window_bounds = array<i64: 3, 72, 128>}, {pipeline_mode = #tpu.pipeline_mode<synchronous>, transform_indices = @transform_2, window_bounds = array<i64: 1, 128>}, {pipeline_mode = #tpu.pipeline_mode<synchronous>, transform_indices = @transform_3, window_bounds = array<i64: 32, 128>}]} {
    %c0 = arith.constant 0 : index
    %c0_0 = arith.constant 0 : index
    %0 = vector.load %arg3[%c0, %c0_0] : memref<1x128xf32, #tpu.memory_space<vmem>>, vector<1x128xf32>
    %c0_1 = arith.constant 0 : index
    %c0_2 = arith.constant 0 : index
    %c0_3 = arith.constant 0 : index
    %1 = vector.load %arg1[%c0_1, %c0_2, %c0_3] : memref<3x32x72xf32, #tpu.memory_space<vmem>>, vector<1x32x72xf32>
    %2 = vector.shape_cast %1 : vector<1x32x72xf32> to vector<32x72xf32>
    %c0_4 = arith.constant 0 : index
    %c0_5 = arith.constant 0 : index
    %c0_6 = arith.constant 0 : index
    %3 = vector.load %arg2[%c0_4, %c0_5, %c0_6] : memref<3x72x128xf32, #tpu.memory_space<vmem>>, vector<1x72x128xf32>
    %4 = vector.shape_cast %3 : vector<1x72x128xf32> to vector<72x128xf32>
    %cst = arith.constant dense<0.000000e+00> : vector<32x128xf32>
    %5 = tpu.matmul %2, %4, %cst {dimension_numbers = #tpu.dot_dimension_numbers<[1], [0], [0], [1], [0, 0, 1, 1], [], []>} : vector<32x72xf32>, vector<72x128xf32>, vector<32x128xf32> -> vector<32x128xf32>
    %6 = vector.broadcast %0 : vector<1x128xf32> to vector<32x128xf32>
    %7 = arith.addf %6, %5 : vector<32x128xf32>
    %c1 = arith.constant 1 : index
    %c0_7 = arith.constant 0 : index
    %c0_8 = arith.constant 0 : index
    %8 = vector.load %arg1[%c1, %c0_7, %c0_8] : memref<3x32x72xf32, #tpu.memory_space<vmem>>, vector<1x32x72xf32>
    %9 = vector.shape_cast %8 : vector<1x32x72xf32> to vector<32x72xf32>
    %c1_9 = arith.constant 1 : index
    %c0_10 = arith.constant 0 : index
    %c0_11 = arith.constant 0 : index
    %10 = vector.load %arg2[%c1_9, %c0_10, %c0_11] : memref<3x72x128xf32, #tpu.memory_space<vmem>>, vector<1x72x128xf32>
    %11 = vector.shape_cast %10 : vector<1x72x128xf32> to vector<72x128xf32>
    %cst_12 = arith.constant dense<0.000000e+00> : vector<32x128xf32>
    %12 = tpu.matmul %9, %11, %cst_12 {dimension_numbers = #tpu.dot_dimension_numbers<[1], [0], [0], [1], [0, 0, 1, 1], [], []>} : vector<32x72xf32>, vector<72x128xf32>, vector<32x128xf32> -> vector<32x128xf32>
    %13 = arith.addf %7, %12 : vector<32x128xf32>
    %c2 = arith.constant 2 : index
    %c0_13 = arith.constant 0 : index
    %c0_14 = arith.constant 0 : index
    %14 = vector.load %arg1[%c2, %c0_13, %c0_14] : memref<3x32x72xf32, #tpu.memory_space<vmem>>, vector<1x32x72xf32>
    %15 = vector.shape_cast %14 : vector<1x32x72xf32> to vector<32x72xf32>
    %c2_15 = arith.constant 2 : index
    %c0_16 = arith.constant 0 : index
    %c0_17 = arith.constant 0 : index
    %16 = vector.load %arg2[%c2_15, %c0_16, %c0_17] : memref<3x72x128xf32, #tpu.memory_space<vmem>>, vector<1x72x128xf32>
    %17 = vector.shape_cast %16 : vector<1x72x128xf32> to vector<72x128xf32>
    %cst_18 = arith.constant dense<0.000000e+00> : vector<32x128xf32>
    %18 = tpu.matmul %15, %17, %cst_18 {dimension_numbers = #tpu.dot_dimension_numbers<[1], [0], [0], [1], [0, 0, 1, 1], [], []>} : vector<32x72xf32>, vector<72x128xf32>, vector<32x128xf32> -> vector<32x128xf32>
    %19 = arith.addf %13, %18 : vector<32x128xf32>
    %c0_19 = arith.constant 0 : index
    %c0_20 = arith.constant 0 : index
    %20 = vector.load %arg4[%c0_19, %c0_20] : memref<32x128xf32, #tpu.memory_space<vmem>>, vector<32x128xf32>
    tpu.vector_store %arg4[%c0_19, %c0_20], %19 {strides = array<i32>} : memref<32x128xf32, #tpu.memory_space<vmem>>, vector<32x128xf32>,
    return
  }
  func.func @transform_0(%arg0: i32) -> (i32, i32, i32) {
    %c0_i32 = arith.constant 0 : i32
    %c0_i32_0 = arith.constant 0 : i32
    %c0_i32_1 = arith.constant 0 : i32
    %c0_i32_2 = arith.constant 0 : i32
    return %c0_i32, %c0_i32_0, %c0_i32_1 : i32, i32, i32
  }
  func.func @transform_1(%arg0: i32) -> (i32, i32, i32) {
    %c0_i32 = arith.constant 0 : i32
    %c0_i32_0 = arith.constant 0 : i32
    %c0_i32_1 = arith.constant 0 : i32
    %c0_i32_2 = arith.constant 0 : i32
    return %c0_i32, %c0_i32_0, %c0_i32_1 : i32, i32, i32
  }
  func.func @transform_2(%arg0: i32) -> (i32, i32) {
    %c0_i32 = arith.constant 0 : i32
    %c0_i32_0 = arith.constant 0 : i32
    %c0_i32_1 = arith.constant 0 : i32
    return %c0_i32, %c0_i32_0 : i32, i32
  }
  func.func @transform_3(%arg0: i32) -> (i32, i32) {
    %c0_i32 = arith.constant 0 : i32
    %c0_i32_0 = arith.constant 0 : i32
    %c0_i32_1 = arith.constant 0 : i32
    return %c0_i32, %c0_i32_0 : i32, i32
  }
}

</mosaic_0001>

<bundles_post_ra>
// kernel: tpu_custom_call.1
= control target key start
LH: loop header
LB: loop body
LE: loop exit
PB: predicated region body
PF: predicated region fallthrough
CT: control target
= control target key end

     0   :  { %8 = vsyncpa [#allocation3], 0  ;;  %s417_s0 = inlined_call_operand.hbm [shape: f32[3,32,72], index: 0, kind: input, shape index: {}]   ;;  %s418_s1 = inlined_call_operand.hbm [shape: f32[3,72,128], index: 1, kind: input, shape index: {}]   ;;  %s419_s2 = inlined_call_operand.vmem [shape: f32[1,128], index: 2, kind: input, shape index: {}]   ;;  %s420_s3 = inlined_call_operand.hbm [shape: f32[32,128], index: 3, kind: output, shape index: {}]  }
   0x1   :  { %9 = vsyncpa [#allocation6], 0 }
   0x2   :  { %10 = vsyncpa [#allocation4], 0  ;;  %s15_s14 = sshll.u32 %s417_s0, 4  ;;  %s359_s15 = smov [#allocation2]   ;;  %s16_s14 = int_to_ptr.hbm [resolvable:$true] %s15_s14 }
   0x3   :  { %s17_s16 = sshll.u32 %s359_s15, 4  ;;  %s28_s19 = sshll.u32 %s418_s1, 4  ;;  %s18_s16 = int_to_ptr.vmem [resolvable:$true] %s17_s16  ;;  %s29_s19 = int_to_ptr.hbm [resolvable:$true] %s28_s19 }
   0x4   :  { %s360_s20 = smov 128   ;;  %s361_s21 = smov 8  }
   0x5   :  { %23 = dma.hbm_to_vmem [thread:$0]  %s16_s14, 1536, %s18_s16, [#allocation3], %s360_s20, %s360_s20, %s361_s21  }
   0x6   :  { %s362_s22 = smov [#allocation5]  }
   0x7   :  { %s30_s23 = sshll.u32 %s362_s22, 4  ;;  %s31_s23 = int_to_ptr.vmem [resolvable:$true] %s30_s23 }
   0x8   :  { %36 = dma.hbm_to_vmem [thread:$0]  %s29_s19, 3456, %s31_s23, [#allocation6], %s360_s20, %s360_s20, %s361_s21  }
   0x9   :  { %353 = dma.done.wait [#allocation3], 1536  }
   0xa   :  { %354 = vsyncadd [#allocation3], 4294965760 }
   0xb   :  { %355 = dma.done.wait [#allocation6], 3456  }
   0xc   :  { %356 = vsyncadd [#allocation6], 4294963840  ;;  %v184_v0 = vld [vmem:[#allocation5 + $0xd0] sm:$0xff]  ;;  %v60_v1 = vld [vmem:[#allocation5 + $0x40] sm:$0xff]  ;;  %vm61_vm0 = vcmask 588800   ;;  %s240_s27 = sshll.u32 %s420_s3, 4  ;;  %s241_s27 = int_to_ptr.hbm [resolvable:$true] %s240_s27 }
   0xd   :  { %v183_v2 = vld [vmem:[#allocation5 + $0xc8] sm:$0xff]  ;;  %204 = vmatpush.msra.mxu2 %v184_v0  ;;  %81 = vmatpush.msra.mxu0 %v60_v1  ;;  %v59_v3 = vld [vmem:[#allocation5 + $0x38] sm:$0xff]  ;;  %v182_v5 = vld [vmem:[#allocation5 + $0xc0] sm:$0xff] }
   0xe   :  { %v124_v4 = vld [vmem:[#allocation5 + $0x88] sm:$0xff]  ;;  %266 = vmatpush.msra.mxu3 %v60_v1  ;;  %v58_v6 = vld [vmem:[#allocation5 + $0x30] sm:$0xff]  ;;  %v123_v7 = vld [vmem:[#allocation5 + $0x80] sm:$0xff] }
   0xf   :  { %144 = vmatpush.msra.mxu1 %v124_v4  ;;  %205 = vmatpush.msra.mxu2 %v183_v2  ;;  %v122_v8 = vld [vmem:[#allocation5 + $0x78] sm:$0xff]  ;;  %v57_v10 = vld [vmem:[#allocation5 + $0x28] sm:$0xff]  ;;  %v121_v11 = vld [vmem:[#allocation5 + $0x70] sm:$0xff] }
  0x10   :  { %82 = vmatpush.msra.mxu0 %v59_v3  ;;  %267 = vmatpush.msra.mxu3 %v59_v3  ;;  %v181_v9 = vld [vmem:[#allocation5 + $0xb8] sm:$0xff]  ;;  %v180_v12 = vld [vmem:[#allocation5 + $0xb0] sm:$0xff]  ;;  %v56_v13 = vld [vmem:[#allocation5 + $0x20] sm:$0xff] }
  0x11   :  { %145 = vmatpush.msra.mxu1 %v123_v7  ;;  %206 = vmatpush.msra.mxu2 %v182_v5  ;;  %v120_v14 = vld [vmem:[#allocation5 + $0x68] sm:$0xff]  ;;  %v55_v16 = vld [vmem:[#allocation5 + $0x18] sm:$0xff]  ;;  %v119_v17 = vld [vmem:[#allocation5 + $0x60] sm:$0xff] }
  0x12   :  { %83 = vmatpush.msra.mxu0 %v58_v6  ;;  %268 = vmatpush.msra.mxu3 %v58_v6  ;;  %v179_v15 = vld [vmem:[#allocation5 + $0xa8] sm:$0xff]  ;;  %v178_v18 = vld [vmem:[#allocation5 + $0xa0] sm:$0xff]  ;;  %v54_v19 = vld [vmem:[#allocation5 + $0x10] sm:$0xff] }
  0x13   :  { %146 = vmatpush.msra.mxu1 %v122_v8  ;;  %207 = vmatpush.msra.mxu2 %v181_v9  ;;  %v118_v20 = vld [vmem:[#allocation5 + $0x58] sm:$0xff]  ;;  %v53_v22 = vld [vmem:[#allocation5 + $0x8] sm:$0xff]  ;;  %v117_v23 = vld [vmem:[#allocation5 + $0x50] sm:$0xff] }
  0x14   :  { %84 = vmatpush.msra.mxu0 %v57_v10  ;;  %269 = vmatpush.msra.mxu3 %v57_v10  ;;  %v177_v21 = vld [vmem:[#allocation5 + $0x98] sm:$0xff]  ;;  %v176_v24 = vld [vmem:[#allocation5 + $0x90] sm:$0xff]  ;;  %v52_v25 = vld [vmem:[#allocation5] sm:$0xff] }
  0x15   :  { %147 = vmatpush.msra.mxu1 %v121_v11  ;;  %208 = vmatpush.msra.mxu2 %v180_v12  ;;  %v171_v26 = vld [vmem:[#allocation2 + $0x40] sm:$0xff]  ;;  %v116_v28 = vld [vmem:[#allocation5 + $0x48] sm:$0xff]  ;;  %v50_v32 = vld [vmem:[#allocation2 + $0x10] sm:$0xff] }
  0x16   :  { %85 = vmatpush.msra.mxu0 %v56_v13  ;;  %270 = vmatpush.msra.mxu3 %v56_v13  ;;  %v48_v27 = vld [vmem:[#allocation2] sm:$0xff]  ;;  %v49_v29 = vld [vmem:[#allocation2 + $0x8] sm:$0xff]  ;;  %v173_v34 = vld [vmem:[#allocation2 + $0x50] sm:$0xff] }
  0x17   :  { %148 = vmatpush.msra.mxu1 %v120_v14  ;;  %209 = vmatpush.msra.mxu2 %v179_v15  ;;  %v111_v30 = vld [vmem:[#allocation2 + $0x20] sm:$0xff]  ;;  %v172_v31 = vld [vmem:[#allocation2 + $0x48] sm:$0xff]  ;;  %v51_v35 = vld [vmem:[#allocation2 + $0x18] sm:$0xff] }
  0x18   :  { %86 = vmatpush.msra.mxu0 %v55_v16  ;;  %271 = vmatpush.msra.mxu3 %v55_v16  ;;  %v112_v33 = vld [vmem:[#allocation2 + $0x28] sm:$0xff]  ;;  %v113_v36 = vld [vmem:[#allocation2 + $0x30] sm:$0xff]  ;;  %v174_v37 = vld [vmem:[#allocation2 + $0x58] sm:$0xff] }
  0x19   :  { %149 = vmatpush.msra.mxu1 %v119_v17  ;;  %210 = vmatpush.msra.mxu2 %v178_v18  ;;  %v114_v38 = vld [vmem:[#allocation2 + $0x38] sm:$0xff]  ;;  %v280_v39 = vld [vmem:[%s419_s2] ss:$0 sm:$0xff]  ;;  %s363_s2 = smov [#allocation7]  }
  0x1a   :  { %87 = vmatpush.msra.mxu0 %v54_v19  ;;  %272 = vmatpush.msra.mxu3 %v54_v19  ;;  %s238_s24 = sshll.u32 %s363_s2, 4  ;;  %s239_s24 = int_to_ptr.vmem [resolvable:$true] %s238_s24 }
  0x1b   :  { %150 = vmatpush.msra.mxu1 %v118_v20  ;;  %211 = vmatpush.msra.mxu2 %v177_v21 }
  0x1c   :  { %88 = vmatpush.msra.mxu0 %v53_v22  ;;  %273 = vmatpush.msra.mxu3 %v53_v22 }
  0x1d   :  { %151 = vmatpush.msra.mxu1 %v117_v23  ;;  %212 = vmatpush.msra.mxu2 %v176_v24 }
  0x1e   :  { %89 = vmatpush.msra.mxu0 %v52_v25  ;;  %262 = vmatmul.msk.f32.vlgmr.msra.gmra.mxu2 %vm61_vm0, %v171_v26 }
  0x1f   :  { %254 = vmatmul.msk.f32.vlgmr.msra.gmra.mxu0 %vm61_vm0, %v48_v27  ;;  %274 = vmatpush.msra.mxu3 %v52_v25 }
  0x20   :  { %152 = vmatpush.msra.mxu1 %v116_v28  ;;  %255 = vmatmul.msk.f32.vlgmr.msra.gmra.mxu3 %vm61_vm0, %v49_v29 }
  0x21   :  { %258 = vmatmul.msk.f32.vlgmr.msra.gmra.mxu1 %vm61_vm0, %v111_v30 }
  0x26   :  { %263 = vmatmul.msk.f32.gmra.mxu2 %vm61_vm0, %v172_v31 }
  0x28   :  { %256 = vmatmul.msk.f32.gmra.mxu3 %vm61_vm0, %v50_v32 }
  0x29   :  { %259 = vmatmul.msk.f32.gmra.mxu1 %vm61_vm0, %v112_v33 }
  0x2e   :  { %264 = vmatmul.msk.f32.gmra.mxu2 %vm61_vm0, %v173_v34 }
  0x30   :  { %257 = vmatmul.msk.f32.gmra.mxu3 %vm61_vm0, %v51_v35 }
  0x31   :  { %260 = vmatmul.msk.f32.gmra.mxu1 %vm61_vm0, %v113_v36 }
  0x36   :  { %265 = vmatmul.msk.f32.gmra.mxu2 %vm61_vm0, %v174_v37 }
  0x39   :  { %261 = vmatmul.msk.f32.gmra.mxu1 %vm61_vm0, %v114_v38 }
  0x9c   :  { %v91_v40 = vpop.f32.mrf.mxu0 }
  0x9d   :  { %v106_v41 = vadd.f32 %v280_v39, %v91_v40 }
  0x9e   :  { %v154_v42 = vpop.f32.mrf.mxu1 }
  0x9f   :  { %v166_v43 = vadd.f32 %v154_v42, %v106_v41 }
  0xa1   :  { %v214_v44 = vpop.f32.mrf.mxu2 }
  0xa2   :  { %v226_v45 = vadd.f32 %v214_v44, %v166_v43 }
  0xa3   :  { %v94_v46 = vpop.f32.mrf.mxu3 }
  0xa4   :  { %230 = vst [vmem:[#allocation7] sm:$0xff] %v226_v45  ;;  %v107_v47 = vadd.f32 %v280_v39, %v94_v46 }
  0xa6   :  { %v157_v48 = vpop.f32.mrf.mxu1 }
  0xa7   :  { %v167_v49 = vadd.f32 %v157_v48, %v107_v47 }
  0xa9   :  { %v217_v50 = vpop.f32.mrf.mxu2 }
  0xaa   :  { %v227_v51 = vadd.f32 %v217_v50, %v167_v49 }
  0xab   :  { %v97_v52 = vpop.f32.mrf.mxu3 }
  0xac   :  { %231 = vst [vmem:[#allocation7 + $0x8] sm:$0xff] %v227_v51  ;;  %v108_v53 = vadd.f32 %v280_v39, %v97_v52 }
  0xae   :  { %v160_v54 = vpop.f32.mrf.mxu1 }
  0xaf   :  { %v168_v55 = vadd.f32 %v160_v54, %v108_v53 }
  0xb1   :  { %v220_v56 = vpop.f32.mrf.mxu2 }
  0xb2   :  { %v228_v57 = vadd.f32 %v220_v56, %v168_v55 }
  0xb3   :  { %v100_v58 = vpop.f32.mrf.mxu3 }
  0xb4   :  { %232 = vst [vmem:[#allocation7 + $0x10] sm:$0xff] %v228_v57  ;;  %v109_v59 = vadd.f32 %v280_v39, %v100_v58 }
  0xb6   :  { %v163_v60 = vpop.f32.mrf.mxu1 }
  0xb7   :  { %v169_v61 = vadd.f32 %v163_v60, %v109_v59 }
  0xb9   :  { %v223_v62 = vpop.f32.mrf.mxu2 }
  0xba   :  { %v229_v63 = vadd.f32 %v223_v62, %v169_v61 }
  0xbc   :  { %233 = vst [vmem:[#allocation7 + $0x18] sm:$0xff] %v229_v63 }
  0xbd   :  { %246 = dma.vmem_to_hbm [thread:$0]  %s239_s24, 512, %s241_s27, [#allocation4], %s360_s20, %s360_s20, %s361_s21  }
  0xbe   :  { %357 = dma.done.wait [#allocation4], 512  }
  0xbf   :  { %358 = vsyncadd [#allocation4], 4294966784 }
  0xc0   :  { %251 = vsyncpa [#allocation3], 1 }
  0xc1   :  { %252 = vsyncpa [#allocation6], 1 }
  0xc2   :  { %253 = vsyncpa [#allocation4], 1 }

</bundles_post_ra>
